<compile_context>
chip_gen: v7x
topology: tpu7x:2x2x1
jax: 0.10.0
libtpu: 0.0.40
codegen_flags: <defaults>
</compile_context>

<pallas_src>
import jax
import jax.numpy as jnp
from jax.experimental import pallas as pl
from jax.experimental.pallas import tpu as pltpu


_LANE = 128                  # lane width: last-dim alignment for every dtype
_TILE_TARGET = 512           # ~85% of HBM roofline per measured BlockSpec data
_BYPASS_ELEMS = 1 << 14      # below this a standalone pallas_call is all overhead


def _round_up(n, m):
    return ((n + m - 1) // m) * m


def _pick_tile(padded_dim):
    """Largest of {512, 256, 128} that divides the (already 128-padded) dim."""
    for t in (_TILE_TARGET, 256, _LANE):
        if padded_dim % t == 0:
            return t
    return _LANE


def _transpose_kernel(x_ref, o_ref):
    # Batch dim is squeezed out by the BlockSpec: x_ref is (TS, TH) in VMEM,
    # o_ref is (TH, TS).  Plain 2-D transpose -> single XLU vxpose path.
    o_ref[...] = x_ref[...].T


def pallas_transpose(x, dim_1, dim_2):
    """Equivalent of torch.Tensor.transpose(dim_1, dim_2)."""
    ndim = x.ndim
    d1 = dim_1 % ndim
    d2 = dim_2 % ndim
    if d1 == d2:
        return x
    lo, hi = sorted((d1, d2))
    if (lo, hi) != (ndim - 2, ndim - 1):
        # TODO(synk): non-trailing axis swaps gain nothing from a standalone
        # Pallas kernel (pure layout change); fall back to XLA's transpose.
        return jnp.swapaxes(x, d1, d2)

    *lead, S, H = x.shape
    B = 1
    for s in lead:
        B *= s

    # Small-tensor bypass: kernel launch + per-step overhead dwarfs the copy
    # (and ideally the transpose is fused into the adjacent conv/matmul).
    if x.size <= _BYPASS_ELEMS:
        return jnp.swapaxes(x, -1, -2)

    x3 = x.reshape(B, S, H)

    # Pad both swapped dims to multiples of 128 so input AND transposed output
    # tiles are (8,128)/(16,128)-aligned and output stores are lane-dense.
    S_pad = _round_up(S, _LANE)
    H_pad = _round_up(H, _LANE)
    if (S_pad, H_pad) != (S, H):
        x3 = jnp.pad(x3, ((0, 0), (0, S_pad - S), (0, H_pad - H)))

    TS = _pick_tile(S_pad)
    TH = _pick_tile(H_pad)
    grid = (B, S_pad // TS, H_pad // TH)

    out3 = pl.pallas_call(
        _transpose_kernel,
        out_shape=jax.ShapeDtypeStruct((B, H_pad, S_pad), x.dtype),
        grid_spec=pltpu.PrefetchScalarGridSpec(
            num_scalar_prefetch=0,
            grid=grid,
            # None squeezes the unit batch dim out of the kernel view.
            in_specs=[pl.BlockSpec((None, TS, TH),
                                   lambda b, i, j: (b, i, j))],
            out_specs=pl.BlockSpec((None, TH, TS),
                                   lambda b, i, j: (b, j, i)),
        ),
        compiler_params=pltpu.CompilerParams(
            dimension_semantics=("parallel", "parallel", "parallel"),
            # Explicit budget: 512x512 f32 tiles double-buffered (in+out) use
            # ~4 MiB, comfortably inside v5e/v6e/v7x scoped-VMEM limits.
            vmem_limit_bytes=32 * 1024 * 1024,
        ),
    )(x3)

    if (S_pad, H_pad) != (S, H):
        out3 = out3[:, :H, :S]
    return out3.reshape(*lead, H, S)


class Transpose:
    """Mirror of the PyTorch nn.Module (no parameters)."""

    def __init__(self, dim_1, dim_2):
        self.dim_1 = dim_1
        self.dim_2 = dim_2

    def __call__(self, x):
        return pallas_transpose(x, self.dim_1, self.dim_2)


if __name__ == "__main__":
    key = jax.random.PRNGKey(0)
    k1, k2, k3 = jax.random.split(key, 3)
    module = Transpose(-1, -2)

    # 1) Tiny FastSpeech2-block shape -> exercises the small-tensor bypass.
    x_small = jax.random.normal(k1, (2, 8, 32), dtype=jnp.float32)
    y_small = jax.block_until_ready(module(x_small))
    assert y_small.shape == (2, 32, 8), y_small.shape
    assert y_small.dtype == x_small.dtype
    assert jnp.array_equal(y_small, jnp.swapaxes(x_small, -1, -2))

    # 2) Ragged f32 shape -> tiled Pallas path with padding + tail slicing.
    x_f32 = jax.random.normal(k2, (2, 160, 256), dtype=jnp.float32)
    y_f32 = jax.block_until_ready(Transpose(1, 2)(x_f32))
    assert y_f32.shape == (2, 256, 160), y_f32.shape
    assert y_f32.dtype == x_f32.dtype
    assert jnp.array_equal(y_f32, jnp.swapaxes(x_f32, 1, 2))

    # 3) bf16 with extra leading dims -> Pallas path, (16,128)-aligned tiles,
    #    leading-axis collapse.
    x_bf16 = jax.random.normal(k3, (2, 2, 128, 384), dtype=jnp.bfloat16)
    y_bf16 = jax.block_until_ready(module(x_bf16))
    assert y_bf16.shape == (2, 2, 384, 128), y_bf16.shape
    assert y_bf16.dtype == x_bf16.dtype
    assert jnp.array_equal(y_bf16, jnp.swapaxes(x_bf16, -1, -2))

    print("KERNEL_OK")
</pallas_src>

<mosaic_0001>
module attributes {stable_mosaic.version = 11 : i64} {
  func.func @_transpose_kernel(%arg0: i32, %arg1: i32, %arg2: i32, %arg3: memref<1x256x256xf32, #tpu.memory_space<vmem>>, %arg4: memref<1x256x256xf32, #tpu.memory_space<vmem>>) attributes {dimension_semantics = [#tpu.dimension_semantics<parallel>, #tpu.dimension_semantics<parallel>, #tpu.dimension_semantics<parallel>], iteration_bounds = array<i64: 2, 1, 1>, scalar_prefetch = 0 : i64, scratch_operands = 0 : i64, tpu.core_type = #tpu.core_type<tc>, window_params = [{transform_indices = @transform_0, window_bounds = array<i64: 1, 256, 256>}, {transform_indices = @transform_1, window_bounds = array<i64: 1, 256, 256>}]} {
    %c0 = arith.constant 0 : index
    %c0_0 = arith.constant 0 : index
    %c0_1 = arith.constant 0 : index
    %0 = vector.load %arg3[%c0, %c0_0, %c0_1] : memref<1x256x256xf32, #tpu.memory_space<vmem>>, vector<1x256x256xf32>
    %1 = vector.shape_cast %0 : vector<1x256x256xf32> to vector<256x256xf32>
    %2 = tpu.transpose %1, [1, 0] : vector<256x256xf32> -> vector<256x256xf32>
    %c0_2 = arith.constant 0 : index
    %c0_3 = arith.constant 0 : index
    %c0_4 = arith.constant 0 : index
    %3 = vector.load %arg4[%c0_2, %c0_3, %c0_4] : memref<1x256x256xf32, #tpu.memory_space<vmem>>, vector<1x256x256xf32>
    %4 = vector.shape_cast %3 : vector<1x256x256xf32> to vector<256x256xf32>
    %5 = vector.shape_cast %2 : vector<256x256xf32> to vector<1x256x256xf32>
    tpu.vector_store %arg4[%c0_2, %c0_3, %c0_4], %5 {strides = array<i32>} : memref<1x256x256xf32, #tpu.memory_space<vmem>>, vector<1x256x256xf32>,
    return
  }
  func.func @transform_0(%arg0: i32, %arg1: i32, %arg2: i32) -> (i32, i32, i32) {
    %c0_i32 = arith.constant 0 : i32
    return %arg0, %arg1, %arg2 : i32, i32, i32
  }
  func.func @transform_1(%arg0: i32, %arg1: i32, %arg2: i32) -> (i32, i32, i32) {
    %c0_i32 = arith.constant 0 : i32
    return %arg0, %arg2, %arg1 : i32, i32, i32
  }
}

</mosaic_0001>

<bundles_post_ra>
// kernel: tpu_custom_call.1
= control target key start
LH: loop header
LB: loop body
LE: loop exit
PB: predicated region body
PF: predicated region fallthrough
CT: control target
= control target key end

     0   :  { %6 = vsyncpa [#allocation3], 0  ;;  %s1065_s0 = inlined_call_operand.hbm [shape: f32[2,256,256], index: 0, kind: input, shape index: {}]   ;;  %s1066_s1 = inlined_call_operand.hbm [shape: f32[2,256,256], index: 1, kind: output, shape index: {}]  }
   0x1   :  { %8 = vsyncpa [#allocation3 + $0x1], 0 }
   0x2   :  { %9 = vsyncpa [#allocation4], 0 }
   0x3   :  { %11 = vsyncpa [#allocation4 + $0x1], 0  ;;  %s753_s6 = smov 0   ;;  %s755_s7 = smov 0  }
   0x4   :  { %s757_s8 = smov 0   ;;  %s759_s9 = smov 0  }
   0x5   :  { %s761_s10 = smov 0   ;;  %s763_s11 = smov 0  }
   0x6 LB: > { %s540_s12 = sadd.s32 4294967295, %s735_s11   ;;  %s541_s13 = sadd.s32 4294967294, %s735_s11   ;;  %s735_s11 = sphi %s763_s11, %s17_s11   ;;  %s731_s10 = sphi %s761_s10, %s1081_s10   ;;  %s727_s9 = sphi %s759_s9, %s1080_s9   ;;  %s723_s8 = sphi %s757_s8, %s1079_s8   ;;  %s719_s7 = sphi %s755_s7, %s1078_s7   ;;  %s715_s6 = sphi %s753_s6, %s1077_s6  }
   0x7   : > { %s36_s14 = sadd.s32 1, %s731_s10  ;;  %s47_s15 = sadd.s32 1, %s723_s8 }
   0x8   : > { %p38_p0 = scmp.ge.s32.totalorder %s36_s14, 2  ;;  %p54_p1 = scmp.ne.s32.totalorder %s723_s8, %s719_s7 }
   0x9   : > { %p55_p2 = scmp.eq.s32.totalorder %s735_s11, 0  ;;  %p60_p3 = scmp.ne.s32.totalorder %s719_s7, %s715_s6 }
   0xa   : > { %s1083_s14 = smov (%p38_p0, %s36_s14), 0  ;;  %p61_p5 = scmp.eq.s32.totalorder %s540_s12, 0 }
   0xb   : > { %p794_p4 = por %p55_p2, %p54_p1  ;;  %s40_s17 = ssub.s32 %s731_s10, %s1083_s14 }
   0xc   : > { %p88_p6 = scmp.eq.s32.totalorder %s540_s12, 1  ;;  %p45_p7 = scmp.eq.s32.totalorder %s40_s17, 0 }
   0xd   : > { %p800_p8 = por %p61_p5, %p60_p3  ;;  %p94_p10 = scmp.eq.s32.totalorder %s541_s13, 1 }
   0xe   : > { %p804_p9 = por %p88_p6, %p54_p1  ;;  %p569_p13 = scmp.lt.s32.totalorder %s735_s11, 2 }
   0xf   : > { %s809_s20 = scalar_select %p45_p7, %s723_s8, %s47_s15  }
  0x10   : > { %s1070_s19 = scalar_select %p804_p9, 1, 0 }
  0x11   : > { %p811_p11 = por %p94_p10, %p60_p3  ;;  %s114_s22 = sand.u32 1, %s723_s8  }
  0x12   : > { %s544_s23 = sshll.u32 %s114_s22, 9  ;;  %s555_s24 = sshll.u32 %s731_s10, 13 }
  0x13   : > { %s1071_s21 = scalar_select %p811_p11, 1, 0 }
  0x14   : > { %s822_s27 = scalar_lea.hbm %s1065_s0, %s555_s24  ;;  %s118_s28 = scalar_lea.vmem [#allocation2], %s544_s23 }
  0x15   : > { %s130_s29 = sshll.u32 %s118_s28, 4  ;;  %p828_p0 = pnand %p569_p13, %p794_p4  ;;  %s824_s29 = int_to_ptr.vmem [resolvable:$true] %s130_s29 }
  0x16   : > { %s833_s2 = scalar_lea.sflag [#allocation3], %s114_s22  ;;  %s623_s3 = scalar_lea.hbm %s822_s27, 8192 }
  0x17   : > { %p624_p2 = scmp.ne.s32.totalorder %s822_s27, %s623_s3  ;;  %p625_p3 = pneg %p828_p0 }
  0x18   : > { %s628_s12 = scalar_lea.hbm %s1065_s0, 16384  ;;  %p629_p4 = scmp.lt.u32.totalorder %s822_s27, %s1065_s0 }
  0x19   : > { %p626_p5 = pnand %p625_p3, %p624_p2  ;;  %p630_p7 = scmp.lt.u32.totalorder %s628_s12, %s623_s3 }
  0x1a   : > { %p632_p13 = scmp.lt.u32.totalorder %s623_s3, %s822_s27 }
  0x1b   : > { %p627_p6 = pneg %p626_p5  ;;  %p631_p10 = por %p630_p7, %p629_p4 }
  0x1d   : > { %p633_p12 = por %p632_p13, %p631_p10 }
  0x1f   : > { %p634_p1 = pnand %p633_p12, %p627_p6 }
  0x21   : > { %637 = shalt.err (!%p634_p1)
}
  0x22   : > { %s638_s16 = scalar_lea.vmem %s824_s29, 8192  ;;  %s737_s17 = smov [#allocation2]  }
  0x23   : > { %p639_p2 = scmp.ne.s32.totalorder %s824_s29, %s638_s16  ;;  %s643_s22 = sshll.u32 %s737_s17, 4  ;;  %s644_s22 = int_to_ptr.vmem [resolvable:$false] %s643_s22 }
  0x24   : > { %s645_s23 = scalar_lea.vmem %s644_s22, 16384  ;;  %p646_p9 = scmp.lt.s32.totalorder %s824_s29, %s644_s22 }
  0x25   : > { %p641_p5 = pnand %p639_p2, %p625_p3  ;;  %p647_p4 = scmp.lt.s32.totalorder %s645_s23, %s638_s16 }
  0x27   : > { %p642_p11 = pneg %p641_p5  ;;  %p648_p7 = por %p647_p4, %p646_p9 }
  0x29   : > { %p649_p10 = pnand %p648_p7, %p642_p11 }
  0x2b   : > { %652 = shalt.err (!%p649_p10)
}
  0x2c   : > { %s738_s24 = smov 256   ;;  %s739_s25 = smov 16  }
  0x2d   : > { %564 = dma.hbm_to_vmem [thread:$0]  (!%p828_p0), %s822_s27, 8192, %s824_s29, %s833_s2, %s738_s24, %s738_s24, %s739_s25  }
  0x2e   : > { %p138_p12 = scmp.lt.s32.totalorder %s735_s11, 3  ;;  %p1073_p1 = scmp.ge.s32.totalorder %s735_s11, 1 }
  0x30   : > { %p139_p3 = pnand %p1073_p1, %p138_p12 }
  0x31   : > { %s865_s26 = sand.u32 (!%p139_p3), 1, %s719_s7  }
  0x32   : > { %142 = sbr.rel (%p139_p3) target bundleno = 327 (0x147), region = 24  ;;  %s548_s28 = sshll.u32 (!%p139_p3), %s865_s26, 9 }
  0x33   : > { %s145_s3 = scalar_lea.sflag (!%p139_p3), [#allocation3], %s865_s26  ;;  %s871_s4 = scalar_lea.vmem (!%p139_p3), [#allocation2], %s548_s28 }
  0x39   : > { %706 = dma.done.wait (%p800_p8), %s145_s3, 8192  }
  0x3a   : > { %708 = vsyncadd (%p800_p8), %s145_s3, 4294959104  ;;  %v172_v0 = vld [vmem:[%s871_s4 + $0x8] sm:$0xff]  ;;  %v171_v1 = vld [vmem:[%s871_s4] sm:$0xff]  ;;  %s943_s18 = scalar_lea.vmem [#allocation5], %s548_s28  ;;  %s556_s27 = sshll.u32 %s727_s9, 13 }
  0x3b   : > { %267 = vxpose.xlu1.b32.start [1/16] %v172_v0, 128  ;;  %235 = vxpose.xlu0.b32.start [1/16] %v171_v1, 128  ;;  %v174_v2 = vld [vmem:[%s871_s4 + $0x18] sm:$0xff]  ;;  %v173_v3 = vld [vmem:[%s871_s4 + $0x10] sm:$0xff]  ;;  %v176_v4 = vld [vmem:[%s871_s4 + $0x28] sm:$0xff]  ;;  %s446_s29 = sshll.u32 %s943_s18, 4  ;;  %s1012_s5 = scalar_lea.hbm %s1066_s1, %s556_s27  ;;  %s1014_s29 = int_to_ptr.vmem [resolvable:$true] %s446_s29 }
  0x3c   : > { %v175_v5 = vld [vmem:[%s871_s4 + $0x20] sm:$0xff]  ;;  %v178_v6 = vld [vmem:[%s871_s4 + $0x38] sm:$0xff]  ;;  %v177_v7 = vld [vmem:[%s871_s4 + $0x30] sm:$0xff]  ;;  %s428_s9 = scalar_lea.sflag [#allocation4], %s865_s26  ;;  %s653_s12 = scalar_lea.vmem %s1014_s29, 8192 }
  0x3d   : > { %v180_v8 = vld [vmem:[%s871_s4 + $0x48] sm:$0xff]  ;;  %v179_v9 = vld [vmem:[%s871_s4 + $0x40] sm:$0xff]  ;;  %v182_v10 = vld [vmem:[%s871_s4 + $0x58] sm:$0xff]  ;;  %p654_p8 = scmp.ne.s32.totalorder %s1014_s29, %s653_s12  ;;  %p1074_p9 = scmp.ne.s32.totalorder %s1070_s19, 0 }
  0x3e   : > { %v181_v11 = vld [vmem:[%s871_s4 + $0x50] sm:$0xff]  ;;  %v184_v12 = vld [vmem:[%s871_s4 + $0x68] sm:$0xff]  ;;  %v183_v13 = vld [vmem:[%s871_s4 + $0x60] sm:$0xff]  ;;  %s740_s13 = smov [#allocation5]  }
  0x3f   : > { %268 = vxpose.xlu1.b32.cont [2/16] %v174_v2, 128  ;;  %236 = vxpose.xlu0.b32.cont [2/16] %v173_v3, 128  ;;  %v186_v14 = vld [vmem:[%s871_s4 + $0x78] sm:$0xff]  ;;  %v185_v15 = vld [vmem:[%s871_s4 + $0x70] sm:$0xff]  ;;  %v188_v16 = vld [vmem:[%s871_s4 + $0x88] sm:$0xff]  ;;  %p655_p11 = pnand %p654_p8, %p1074_p9  ;;  %s657_s15 = sshll.u32 %s740_s13, 4  ;;  %s658_s15 = int_to_ptr.vmem [resolvable:$false] %s657_s15 }
  0x40   : > { %v187_v17 = vld [vmem:[%s871_s4 + $0x80] sm:$0xff]  ;;  %v190_v18 = vld [vmem:[%s871_s4 + $0x98] sm:$0xff]  ;;  %v189_v19 = vld [vmem:[%s871_s4 + $0x90] sm:$0xff]  ;;  %s659_s16 = scalar_lea.vmem %s658_s15, 16384  ;;  %p660_p6 = scmp.lt.s32.totalorder %s1014_s29, %s658_s15 }
  0x41   : > { %v192_v20 = vld [vmem:[%s871_s4 + $0xa8] sm:$0xff]  ;;  %v191_v21 = vld [vmem:[%s871_s4 + $0xa0] sm:$0xff]  ;;  %v194_v22 = vld [vmem:[%s871_s4 + $0xb8] sm:$0xff]  ;;  %p656_p0 = pneg %p655_p11  ;;  %p661_p13 = scmp.lt.s32.totalorder %s659_s16, %s653_s12 }
  0x42   : > { %v193_v23 = vld [vmem:[%s871_s4 + $0xb0] sm:$0xff]  ;;  %v196_v24 = vld [vmem:[%s871_s4 + $0xc8] sm:$0xff]  ;;  %v195_v25 = vld [vmem:[%s871_s4 + $0xc0] sm:$0xff] }
  0x43   : > { %269 = vxpose.xlu1.b32.cont [3/16] %v176_v4, 128  ;;  %237 = vxpose.xlu0.b32.cont [3/16] %v175_v5, 128  ;;  %v198_v26 = vld [vmem:[%s871_s4 + $0xd8] sm:$0xff]  ;;  %v197_v27 = vld [vmem:[%s871_s4 + $0xd0] sm:$0xff]  ;;  %v200_v28 = vld [vmem:[%s871_s4 + $0xe8] sm:$0xff]  ;;  %p662_p2 = por %p661_p13, %p660_p6 }
  0x44   : > { %v199_v29 = vld [vmem:[%s871_s4 + $0xe0] sm:$0xff]  ;;  %v202_v30 = vld [vmem:[%s871_s4 + $0xf8] sm:$0xff]  ;;  %v201_v31 = vld [vmem:[%s871_s4 + $0xf0] sm:$0xff] }
  0x45   : > { %v204_v32 = vld [vmem:[%s871_s4 + $0x108] sm:$0xff]  ;;  %v203_v33 = vld [vmem:[%s871_s4 + $0x100] sm:$0xff]  ;;  %v206_v34 = vld [vmem:[%s871_s4 + $0x118] sm:$0xff]  ;;  %p663_p5 = pnand %p662_p2, %p656_p0 }
  0x46   : > { %v205_v35 = vld [vmem:[%s871_s4 + $0x110] sm:$0xff]  ;;  %v208_v36 = vld [vmem:[%s871_s4 + $0x128] sm:$0xff]  ;;  %v207_v37 = vld [vmem:[%s871_s4 + $0x120] sm:$0xff] }
  0x47   : > { %270 = vxpose.xlu1.b32.cont [4/16] %v178_v6, 128  ;;  %238 = vxpose.xlu0.b32.cont [4/16] %v177_v7, 128  ;;  %v210_v38 = vld [vmem:[%s871_s4 + $0x138] sm:$0xff]  ;;  %v209_v39 = vld [vmem:[%s871_s4 + $0x130] sm:$0xff]  ;;  %v212_v40 = vld [vmem:[%s871_s4 + $0x148] sm:$0xff] }
  0x48   : > { %v211_v41 = vld [vmem:[%s871_s4 + $0x140] sm:$0xff]  ;;  %v214_v42 = vld [vmem:[%s871_s4 + $0x158] sm:$0xff]  ;;  %v213_v43 = vld [vmem:[%s871_s4 + $0x150] sm:$0xff] }
  0x49   : > { %v216_v44 = vld [vmem:[%s871_s4 + $0x168] sm:$0xff]  ;;  %v215_v45 = vld [vmem:[%s871_s4 + $0x160] sm:$0xff]  ;;  %v218_v46 = vld [vmem:[%s871_s4 + $0x178] sm:$0xff] }
  0x4a   : > { %v217_v47 = vld [vmem:[%s871_s4 + $0x170] sm:$0xff]  ;;  %v220_v48 = vld [vmem:[%s871_s4 + $0x188] sm:$0xff]  ;;  %v219_v49 = vld [vmem:[%s871_s4 + $0x180] sm:$0xff] }
  0x4b   : > { %271 = vxpose.xlu1.b32.cont [5/16] %v180_v8, 128  ;;  %239 = vxpose.xlu0.b32.cont [5/16] %v179_v9, 128  ;;  %v222_v50 = vld [vmem:[%s871_s4 + $0x198] sm:$0xff]  ;;  %v221_v51 = vld [vmem:[%s871_s4 + $0x190] sm:$0xff]  ;;  %v224_v52 = vld [vmem:[%s871_s4 + $0x1a8] sm:$0xff] }
  0x4c   : > { %v223_v53 = vld [vmem:[%s871_s4 + $0x1a0] sm:$0xff]  ;;  %v226_v54 = vld [vmem:[%s871_s4 + $0x1b8] sm:$0xff]  ;;  %v225_v55 = vld [vmem:[%s871_s4 + $0x1b0] sm:$0xff] }
  0x4d   : > { %v228_v56 = vld [vmem:[%s871_s4 + $0x1c8] sm:$0xff]  ;;  %v227_v57 = vld [vmem:[%s871_s4 + $0x1c0] sm:$0xff]  ;;  %v230_v58 = vld [vmem:[%s871_s4 + $0x1d8] sm:$0xff] }
  0x4e   : > { %v229_v59 = vld [vmem:[%s871_s4 + $0x1d0] sm:$0xff]  ;;  %v232_v60 = vld [vmem:[%s871_s4 + $0x1e8] sm:$0xff]  ;;  %v231_v61 = vld [vmem:[%s871_s4 + $0x1e0] sm:$0xff] }
  0x4f   : > { %272 = vxpose.xlu1.b32.cont [6/16] %v182_v10, 128  ;;  %240 = vxpose.xlu0.b32.cont [6/16] %v181_v11, 128  ;;  %v234_v62 = vld [vmem:[%s871_s4 + $0x1f8] sm:$0xff]  ;;  %v233_v63 = vld [vmem:[%s871_s4 + $0x1f0] sm:$0xff] }
  0x53   : > { %273 = vxpose.xlu1.b32.cont [7/16] %v184_v12, 128  ;;  %241 = vxpose.xlu0.b32.cont [7/16] %v183_v13, 128 }
  0x57   : > { %274 = vxpose.xlu1.b32.cont [8/16] %v186_v14, 128  ;;  %242 = vxpose.xlu0.b32.cont [8/16] %v185_v15, 128 }
  0x5b   : > { %275 = vxpose.xlu1.b32.cont [9/16] %v188_v16, 128  ;;  %243 = vxpose.xlu0.b32.cont [9/16] %v187_v17, 128 }
  0x5f   : > { %276 = vxpose.xlu1.b32.cont [10/16] %v190_v18, 128  ;;  %244 = vxpose.xlu0.b32.cont [10/16] %v189_v19, 128 }
  0x63   : > { %277 = vxpose.xlu1.b32.cont [11/16] %v192_v20, 128  ;;  %245 = vxpose.xlu0.b32.cont [11/16] %v191_v21, 128 }
  0x67   : > { %278 = vxpose.xlu1.b32.cont [12/16] %v194_v22, 128  ;;  %246 = vxpose.xlu0.b32.cont [12/16] %v193_v23, 128 }
  0x6b   : > { %279 = vxpose.xlu1.b32.cont [13/16] %v196_v24, 128  ;;  %247 = vxpose.xlu0.b32.cont [13/16] %v195_v25, 128 }
  0x6f   : > { %280 = vxpose.xlu1.b32.cont [14/16] %v198_v26, 128  ;;  %248 = vxpose.xlu0.b32.cont [14/16] %v197_v27, 128 }
  0x73   : > { %281 = vxpose.xlu1.b32.cont [15/16] %v200_v28, 128  ;;  %249 = vxpose.xlu0.b32.cont [15/16] %v199_v29, 128 }
  0x77   : > { %282 = vxpose.xlu1.b32.end [16/16] %v202_v30, 128  ;;  %250 = vxpose.xlu0.b32.end [16/16] %v201_v31, 128 }
  0x7b   : > { %331 = vxpose.xlu1.b32.start [1/16] %v204_v32, 128  ;;  %299 = vxpose.xlu0.b32.start [1/16] %v203_v33, 128 }
  0x7f   : > { %332 = vxpose.xlu1.b32.cont [2/16] %v206_v34, 128  ;;  %300 = vxpose.xlu0.b32.cont [2/16] %v205_v35, 128 }
  0x83   : > { %333 = vxpose.xlu1.b32.cont [3/16] %v208_v36, 128  ;;  %301 = vxpose.xlu0.b32.cont [3/16] %v207_v37, 128 }
  0x87   : > { %334 = vxpose.xlu1.b32.cont [4/16] %v210_v38, 128  ;;  %302 = vxpose.xlu0.b32.cont [4/16] %v209_v39, 128 }
  0x8b   : > { %335 = vxpose.xlu1.b32.cont [5/16] %v212_v40, 128  ;;  %303 = vxpose.xlu0.b32.cont [5/16] %v211_v41, 128 }
  0x8f   : > { %336 = vxpose.xlu1.b32.cont [6/16] %v214_v42, 128  ;;  %304 = vxpose.xlu0.b32.cont [6/16] %v213_v43, 128 }
  0x93   : > { %337 = vxpose.xlu1.b32.cont [7/16] %v216_v44, 128  ;;  %305 = vxpose.xlu0.b32.cont [7/16] %v215_v45, 128 }
  0x97   : > { %338 = vxpose.xlu1.b32.cont [8/16] %v218_v46, 128  ;;  %306 = vxpose.xlu0.b32.cont [8/16] %v217_v47, 128 }
  0x9b   : > { %339 = vxpose.xlu1.b32.cont [9/16] %v220_v48, 128  ;;  %307 = vxpose.xlu0.b32.cont [9/16] %v219_v49, 128 }
  0x9f   : > { %340 = vxpose.xlu1.b32.cont [10/16] %v222_v50, 128  ;;  %308 = vxpose.xlu0.b32.cont [10/16] %v221_v51, 128 }
  0xa3   : > { %341 = vxpose.xlu1.b32.cont [11/16] %v224_v52, 128  ;;  %309 = vxpose.xlu0.b32.cont [11/16] %v223_v53, 128 }
  0xa7   : > { %342 = vxpose.xlu1.b32.cont [12/16] %v226_v54, 128  ;;  %310 = vxpose.xlu0.b32.cont [12/16] %v225_v55, 128 }
  0xab   : > { %343 = vxpose.xlu1.b32.cont [13/16] %v228_v56, 128  ;;  %311 = vxpose.xlu0.b32.cont [13/16] %v227_v57, 128 }
  0xaf   : > { %344 = vxpose.xlu1.b32.cont [14/16] %v230_v58, 128  ;;  %312 = vxpose.xlu0.b32.cont [14/16] %v229_v59, 128 }
  0xb3   : > { %345 = vxpose.xlu1.b32.cont [15/16] %v232_v60, 128  ;;  %313 = vxpose.xlu0.b32.cont [15/16] %v231_v61, 128 }
  0xb7   : > { %346 = vxpose.xlu1.b32.end [16/16] %v234_v62, 128  ;;  %314 = vxpose.xlu0.b32.end [16/16] %v233_v63, 128 }
  0xbb   : > { %v283_v0 = vpop.trf.xlu1  ;;  %v251_v1 = vpop.trf.xlu0 }
  0xbc   : > { %395 = vst [vmem:[%s943_s18 + $0x100] sm:$0xff] %v283_v0  ;;  %363 = vst [vmem:[%s943_s18] sm:$0xff] %v251_v1 }
  0xbf   : > { %v284_v2 = vpop.trf.xlu1  ;;  %v252_v3 = vpop.trf.xlu0 }
  0xc0   : > { %397 = vst [vmem:[%s943_s18 + $0x110] sm:$0xff] %v284_v2  ;;  %365 = vst [vmem:[%s943_s18 + $0x10] sm:$0xff] %v252_v3 }
  0xc3   : > { %v285_v4 = vpop.trf.xlu1  ;;  %v253_v5 = vpop.trf.xlu0 }
  0xc4   : > { %399 = vst [vmem:[%s943_s18 + $0x120] sm:$0xff] %v285_v4  ;;  %367 = vst [vmem:[%s943_s18 + $0x20] sm:$0xff] %v253_v5 }
  0xc7   : > { %v286_v6 = vpop.trf.xlu1  ;;  %v254_v7 = vpop.trf.xlu0 }
  0xc8   : > { %401 = vst [vmem:[%s943_s18 + $0x130] sm:$0xff] %v286_v6  ;;  %369 = vst [vmem:[%s943_s18 + $0x30] sm:$0xff] %v254_v7 }
  0xcb   : > { %v287_v8 = vpop.trf.xlu1  ;;  %v255_v9 = vpop.trf.xlu0 }
  0xcc   : > { %403 = vst [vmem:[%s943_s18 + $0x140] sm:$0xff] %v287_v8  ;;  %371 = vst [vmem:[%s943_s18 + $0x40] sm:$0xff] %v255_v9 }
  0xcf   : > { %v288_v10 = vpop.trf.xlu1  ;;  %v256_v11 = vpop.trf.xlu0 }
  0xd0   : > { %405 = vst [vmem:[%s943_s18 + $0x150] sm:$0xff] %v288_v10  ;;  %373 = vst [vmem:[%s943_s18 + $0x50] sm:$0xff] %v256_v11 }
  0xd3   : > { %v289_v12 = vpop.trf.xlu1  ;;  %v257_v13 = vpop.trf.xlu0 }
  0xd4   : > { %407 = vst [vmem:[%s943_s18 + $0x160] sm:$0xff] %v289_v12  ;;  %375 = vst [vmem:[%s943_s18 + $0x60] sm:$0xff] %v257_v13 }
  0xd7   : > { %v290_v14 = vpop.trf.xlu1  ;;  %v258_v15 = vpop.trf.xlu0 }
  0xd8   : > { %409 = vst [vmem:[%s943_s18 + $0x170] sm:$0xff] %v290_v14  ;;  %377 = vst [vmem:[%s943_s18 + $0x70] sm:$0xff] %v258_v15 }
  0xdb   : > { %v291_v16 = vpop.trf.xlu1  ;;  %v259_v17 = vpop.trf.xlu0 }
  0xdc   : > { %411 = vst [vmem:[%s943_s18 + $0x180] sm:$0xff] %v291_v16  ;;  %379 = vst [vmem:[%s943_s18 + $0x80] sm:$0xff] %v259_v17 }
  0xdf   : > { %v292_v18 = vpop.trf.xlu1  ;;  %v260_v19 = vpop.trf.xlu0 }
  0xe0   : > { %413 = vst [vmem:[%s943_s18 + $0x190] sm:$0xff] %v292_v18  ;;  %381 = vst [vmem:[%s943_s18 + $0x90] sm:$0xff] %v260_v19 }
  0xe3   : > { %v293_v20 = vpop.trf.xlu1  ;;  %v261_v21 = vpop.trf.xlu0 }
  0xe4   : > { %415 = vst [vmem:[%s943_s18 + $0x1a0] sm:$0xff] %v293_v20  ;;  %383 = vst [vmem:[%s943_s18 + $0xa0] sm:$0xff] %v261_v21 }
  0xe7   : > { %v294_v22 = vpop.trf.xlu1  ;;  %v262_v23 = vpop.trf.xlu0 }
  0xe8   : > { %417 = vst [vmem:[%s943_s18 + $0x1b0] sm:$0xff] %v294_v22  ;;  %385 = vst [vmem:[%s943_s18 + $0xb0] sm:$0xff] %v262_v23 }
  0xeb   : > { %v295_v24 = vpop.trf.xlu1  ;;  %v263_v25 = vpop.trf.xlu0 }
  0xec   : > { %419 = vst [vmem:[%s943_s18 + $0x1c0] sm:$0xff] %v295_v24  ;;  %387 = vst [vmem:[%s943_s18 + $0xc0] sm:$0xff] %v263_v25 }
  0xef   : > { %v296_v26 = vpop.trf.xlu1  ;;  %v264_v27 = vpop.trf.xlu0 }
  0xf0   : > { %421 = vst [vmem:[%s943_s18 + $0x1d0] sm:$0xff] %v296_v26  ;;  %389 = vst [vmem:[%s943_s18 + $0xd0] sm:$0xff] %v264_v27 }
  0xf3   : > { %v297_v28 = vpop.trf.xlu1  ;;  %v265_v29 = vpop.trf.xlu0 }
  0xf4   : > { %423 = vst [vmem:[%s943_s18 + $0x1e0] sm:$0xff] %v297_v28  ;;  %391 = vst [vmem:[%s943_s18 + $0xe0] sm:$0xff] %v265_v29 }
  0xf7   : > { %v298_v30 = vpop.trf.xlu1  ;;  %v266_v31 = vpop.trf.xlu0 }
  0xf8   : > { %425 = vst [vmem:[%s943_s18 + $0x1f0] sm:$0xff] %v298_v30  ;;  %393 = vst [vmem:[%s943_s18 + $0xf0] sm:$0xff] %v266_v31 }
  0xfb   : > { %v347_v32 = vpop.trf.xlu1  ;;  %v315_v33 = vpop.trf.xlu0 }
  0xfc   : > { %396 = vst [vmem:[%s943_s18 + $0x108] sm:$0xff] %v347_v32  ;;  %364 = vst [vmem:[%s943_s18 + $0x8] sm:$0xff] %v315_v33 }
  0xff   : > { %v348_v34 = vpop.trf.xlu1  ;;  %v316_v35 = vpop.trf.xlu0 }
 0x100   : > { %398 = vst [vmem:[%s943_s18 + $0x118] sm:$0xff] %v348_v34  ;;  %366 = vst [vmem:[%s943_s18 + $0x18] sm:$0xff] %v316_v35 }
 0x103   : > { %v349_v36 = vpop.trf.xlu1  ;;  %v317_v37 = vpop.trf.xlu0 }
 0x104   : > { %400 = vst [vmem:[%s943_s18 + $0x128] sm:$0xff] %v349_v36  ;;  %368 = vst [vmem:[%s943_s18 + $0x28] sm:$0xff] %v317_v37 }
 0x107   : > { %v350_v38 = vpop.trf.xlu1  ;;  %v318_v39 = vpop.trf.xlu0 }
 0x108   : > { %402 = vst [vmem:[%s943_s18 + $0x138] sm:$0xff] %v350_v38  ;;  %370 = vst [vmem:[%s943_s18 + $0x38] sm:$0xff] %v318_v39 }
 0x10b   : > { %v351_v40 = vpop.trf.xlu1  ;;  %v319_v41 = vpop.trf.xlu0 }
 0x10c   : > { %404 = vst [vmem:[%s943_s18 + $0x148] sm:$0xff] %v351_v40  ;;  %372 = vst [vmem:[%s943_s18 + $0x48] sm:$0xff] %v319_v41 }
 0x10f   : > { %v352_v42 = vpop.trf.xlu1  ;;  %v320_v43 = vpop.trf.xlu0 }
 0x110   : > { %406 = vst [vmem:[%s943_s18 + $0x158] sm:$0xff] %v352_v42  ;;  %374 = vst [vmem:[%s943_s18 + $0x58] sm:$0xff] %v320_v43 }
 0x113   : > { %v353_v44 = vpop.trf.xlu1  ;;  %v321_v45 = vpop.trf.xlu0 }
 0x114   : > { %408 = vst [vmem:[%s943_s18 + $0x168] sm:$0xff] %v353_v44  ;;  %376 = vst [vmem:[%s943_s18 + $0x68] sm:$0xff] %v321_v45 }
 0x117   : > { %v354_v46 = vpop.trf.xlu1  ;;  %v322_v47 = vpop.trf.xlu0 }
 0x118   : > { %410 = vst [vmem:[%s943_s18 + $0x178] sm:$0xff] %v354_v46  ;;  %378 = vst [vmem:[%s943_s18 + $0x78] sm:$0xff] %v322_v47 }
 0x11b   : > { %v355_v48 = vpop.trf.xlu1  ;;  %v323_v49 = vpop.trf.xlu0 }
 0x11c   : > { %412 = vst [vmem:[%s943_s18 + $0x188] sm:$0xff] %v355_v48  ;;  %380 = vst [vmem:[%s943_s18 + $0x88] sm:$0xff] %v323_v49 }
 0x11f   : > { %v356_v50 = vpop.trf.xlu1  ;;  %v324_v51 = vpop.trf.xlu0 }
 0x120   : > { %414 = vst [vmem:[%s943_s18 + $0x198] sm:$0xff] %v356_v50  ;;  %382 = vst [vmem:[%s943_s18 + $0x98] sm:$0xff] %v324_v51 }
 0x123   : > { %v357_v52 = vpop.trf.xlu1  ;;  %v325_v53 = vpop.trf.xlu0 }
 0x124   : > { %416 = vst [vmem:[%s943_s18 + $0x1a8] sm:$0xff] %v357_v52  ;;  %384 = vst [vmem:[%s943_s18 + $0xa8] sm:$0xff] %v325_v53 }
 0x127   : > { %v358_v54 = vpop.trf.xlu1  ;;  %v326_v55 = vpop.trf.xlu0 }
 0x128   : > { %418 = vst [vmem:[%s943_s18 + $0x1b8] sm:$0xff] %v358_v54  ;;  %386 = vst [vmem:[%s943_s18 + $0xb8] sm:$0xff] %v326_v55 }
 0x12b   : > { %v359_v56 = vpop.trf.xlu1  ;;  %v327_v57 = vpop.trf.xlu0 }
 0x12c   : > { %420 = vst [vmem:[%s943_s18 + $0x1c8] sm:$0xff] %v359_v56  ;;  %388 = vst [vmem:[%s943_s18 + $0xc8] sm:$0xff] %v327_v57 }
 0x12f   : > { %v360_v58 = vpop.trf.xlu1  ;;  %v328_v59 = vpop.trf.xlu0 }
 0x130   : > { %422 = vst [vmem:[%s943_s18 + $0x1d8] sm:$0xff] %v360_v58  ;;  %390 = vst [vmem:[%s943_s18 + $0xd8] sm:$0xff] %v328_v59 }
 0x133   : > { %v361_v60 = vpop.trf.xlu1  ;;  %v329_v61 = vpop.trf.xlu0 }
 0x134   : > { %424 = vst [vmem:[%s943_s18 + $0x1e8] sm:$0xff] %v361_v60  ;;  %392 = vst [vmem:[%s943_s18 + $0xe8] sm:$0xff] %v329_v61 }
 0x137   : > { %v362_v62 = vpop.trf.xlu1  ;;  %v330_v63 = vpop.trf.xlu0 }
 0x138   : > { %426 = vst [vmem:[%s943_s18 + $0x1f8] sm:$0xff] %v362_v62  ;;  %394 = vst [vmem:[%s943_s18 + $0xf8] sm:$0xff] %v330_v63 }
 0x139   : > { %666 = shalt.err (!%p663_p5)
}
 0x13a   : > { %s667_s17 = scalar_lea.hbm %s1012_s5, 8192  ;;  %s671_s24 = scalar_lea.hbm %s1066_s1, 16384 }
 0x13b   : > { %p668_p4 = scmp.ne.s32.totalorder %s1012_s5, %s667_s17  ;;  %p672_p12 = scmp.lt.u32.totalorder %s1012_s5, %s1066_s1 }
 0x13c   : > { %p673_p1 = scmp.lt.u32.totalorder %s671_s24, %s667_s17  ;;  %p675_p8 = scmp.lt.u32.totalorder %s667_s17, %s1012_s5 }
 0x13d   : > { %p669_p7 = pnand %p668_p4, %p1074_p9 }
 0x13e   : > { %p674_p3 = por %p673_p1, %p672_p12 }
 0x13f   : > { %p670_p10 = pneg %p669_p7 }
 0x140   : > { %p676_p11 = por %p675_p8, %p674_p3 }
 0x142   : > { %p677_p0 = pnand %p676_p11, %p670_p10 }
 0x144   : > { %680 = shalt.err (!%p677_p0)
}
 0x145   : > { %s741_s3 = smov 256   ;;  %s742_s4 = smov 16  }
 0x146   : > { %559 = dma.vmem_to_hbm [thread:$0]  (%p1074_p9), %s1014_s29, 8192, %s1012_s5, %s428_s9, %s741_s3, %s741_s3, %s742_s4  }
 0x147 PF: > { %s461_s18 = sand.u32 1, %s715_s6   ;;  %p1075_p6 = scmp.ne.s32.totalorder %s1071_s21, 0 }
 0x148   : > { %p1076_p13 = scmp.ge.s32.totalorder %s735_s11, 2  ;;  %s462_s27 = scalar_lea.sflag [#allocation4], %s461_s18 }
 0x14a   : > { %p566_p2 = pnand %p1076_p13, %p1075_p6 }
 0x14c   : > { %710 = dma.done.wait (!%p566_p2), %s462_s27, 8192  }
 0x14d   : > { %712 = vsyncadd (!%p566_p2), %s462_s27, 4294959104  ;;  %s17_s11 = sadd.s32 1, %s735_s11   ;;  %s1077_s6 = smov %s719_s7 }
 0x14e   : > { %p14_p5 = scmp.ge.s32.totalorder %s17_s11, 4   ;;  %s1078_s7 = smov %s723_s8 }
 0x14f   : > { %s1079_s8 = smov %s809_s20  ;;  %s1080_s9 = smov %s731_s10 }
 0x150   : > { %s1081_s10 = smov %s1083_s14  ;;  %16 = sbr.rel (!%p14_p5) target bundleno = 6 (0x6), region = 69 }
 0x157   :  { %467 = vsyncpa [#allocation3], 1 }
 0x158   :  { %469 = vsyncpa [#allocation3 + $0x1], 1 }
 0x159   :  { %470 = vsyncpa [#allocation4], 1 }
 0x15a   :  { %472 = vsyncpa [#allocation4 + $0x1], 1 }

</bundles_post_ra>
